<compile_context>
chip_gen: v7x
topology: tpu7x:2x2x1
jax: 0.10.0
libtpu: 0.0.40
codegen_flags: <defaults>
</compile_context>

<pallas_src>
import jax
import jax.numpy as jnp
from jax.experimental import pallas as pl
from jax.experimental.pallas import tpu as pltpu

LAYER_DIMS = [8, 256, 128, 64, 32, 16, 8, 4, 1]   # input_dim=8, output=1
BN_EPS = 1e-5
LANES = 256                                       # lane width of the packed param slab

# Row offsets inside the packed (352, 256) parameter slab (all sublane-aligned).
_OFF_W1, _ROWS_W1 = 0, 8        # (8, 256)   linear1
_OFF_W23, _ROWS_W23 = 8, 256    # (256, 64)  fused linear2 . dropout . linear3
_OFF_W45, _ROWS_W45 = 264, 64   # (64, 16)   fused linear4 . BN(eval) . linear5
_OFF_W67, _ROWS_W67 = 328, 16   # (16, 4)    fused linear6 . dropout . linear7
_OFF_BIAS = 344                 # (8, 256) tail: b1, b23, b45, b67, w8-row, b8, pad, pad
_SLAB_ROWS = 352


def _mlp_kernel(x_ref, p_ref, out_ref):
    x = x_ref[...]                                                   # (B, 8) f32

    w1 = p_ref[pl.ds(_OFF_W1, _ROWS_W1), :]                          # (8, 256)
    w23 = p_ref[pl.ds(_OFF_W23, _ROWS_W23), pl.ds(0, 64)]            # (256, 64)
    w45 = p_ref[pl.ds(_OFF_W45, _ROWS_W45), pl.ds(0, 16)]            # (64, 16)
    w67 = p_ref[pl.ds(_OFF_W67, _ROWS_W67), pl.ds(0, 4)]             # (16, 4)

    tail = p_ref[pl.ds(_OFF_BIAS, 8), :]                             # one aligned (8,256) load
    b1 = tail[0:1, :]                                                # (1, 256)
    b23 = tail[1:2, 0:64]
    b45 = tail[2:3, 0:16]
    b67 = tail[3:4, 0:4]
    w8v = tail[4:5, 0:4]                                             # last-layer weight row
    b8 = tail[5:6, 0:1]                                              # (1, 1)

    h = jnp.maximum(jnp.dot(x, w1, preferred_element_type=jnp.float32) + b1, 0.0)
    h = jnp.maximum(jnp.dot(h, w23, preferred_element_type=jnp.float32) + b23, 0.0)
    h = jnp.maximum(jnp.dot(h, w45, preferred_element_type=jnp.float32) + b45, 0.0)
    h = jnp.maximum(jnp.dot(h, w67, preferred_element_type=jnp.float32) + b67, 0.0)
    # Final 4 -> 1 layer on the VPU: a K=4, N=1 MXU matmul would waste a full
    # push/drain round trip on the critical path.
    out_ref[...] = (jnp.sum(h * w8v, axis=-1, keepdims=True) + b8).astype(out_ref.dtype)


def init_params(key):
    """PyTorch-style init: W, b ~ U(-1/sqrt(fan_in), 1/sqrt(fan_in)).

    BatchNorm gamma/beta/running_mean/running_var are given non-trivial values so
    the host-side BN fold is actually exercised by the correctness check."""
    params = []
    for i in range(len(LAYER_DIMS) - 1):
        fan_in, fan_out = LAYER_DIMS[i], LAYER_DIMS[i + 1]
        key, kw, kb = jax.random.split(key, 3)
        bound = fan_in ** -0.5
        w = jax.random.uniform(kw, (fan_in, fan_out), jnp.float32, -bound, bound)
        b = jax.random.uniform(kb, (fan_out,), jnp.float32, -bound, bound)
        params.append((w, b))
    key, kg, kbeta, km, kv = jax.random.split(key, 5)
    gamma = 1.0 + 0.1 * jax.random.normal(kg, (32,), jnp.float32)
    beta = 0.1 * jax.random.normal(kbeta, (32,), jnp.float32)
    running_mean = 0.1 * jax.random.normal(km, (32,), jnp.float32)
    running_var = jax.random.uniform(kv, (32,), jnp.float32, 0.5, 1.5)
    return params, (gamma, beta, running_mean, running_var)


def pack_params(params, bn):
    """Fuse the purely-affine segments (exact in eval mode) and pack everything
    into a single (352, 256) f32 slab -> one HBM->VMEM DMA instead of 18."""
    (w1, b1), (w2, b2), (w3, b3), (w4, b4), (w5, b5), (w6, b6), (w7, b7), (w8, b8) = params
    gamma, beta, mean, var = bn

    # linear2 . dropout . linear3  ->  one affine (256 -> 64)
    w23 = w2 @ w3
    b23 = b2 @ w3 + b3
    # linear4 . BN(eval) . linear5 ->  one affine (64 -> 16)
    s = gamma * jax.lax.rsqrt(var + BN_EPS)
    t = beta - mean * s
    w45 = (w4 * s[None, :]) @ w5
    b45 = (b4 * s + t) @ w5 + b5
    # linear6 . dropout . linear7  ->  one affine (16 -> 4)
    w67 = w6 @ w7
    b67 = b6 @ w7 + b7

    def pad_lanes(m):
        return jnp.pad(m, ((0, 0), (0, LANES - m.shape[1])))

    tail = jnp.zeros((8, LANES), jnp.float32)
    tail = tail.at[0, :256].set(b1)
    tail = tail.at[1, :64].set(b23)
    tail = tail.at[2, :16].set(b45)
    tail = tail.at[3, :4].set(b67)
    tail = tail.at[4, :4].set(w8[:, 0])
    tail = tail.at[5, 0].set(b8[0])

    slab = jnp.concatenate([
        pad_lanes(w1),    # rows   0..7
        pad_lanes(w23),   # rows   8..263
        pad_lanes(w45),   # rows 264..327
        pad_lanes(w67),   # rows 328..343
        tail,             # rows 344..351
    ], axis=0)
    assert slab.shape == (_SLAB_ROWS, LANES), slab.shape
    return slab


def mlp_forward(x, packed, *, batch_block=1024):
    batch, in_dim = x.shape
    x = x.astype(jnp.float32)
    flops = 2 * batch * (8 * 256 + 256 * 64 + 64 * 16 + 16 * 4 + 4)
    cost = pl.CostEstimate(flops=flops, transcendentals=0,
                           bytes_accessed=4 * (x.size + packed.size + batch))

    if batch <= batch_block:
        # Tiny batch: single gridless, fully VMEM-resident call.
        padded = max(8, pl.cdiv(batch, 8) * 8)        # keep sublane-aligned rows
        xp = x if padded == batch else jnp.pad(x, ((0, padded - batch), (0, 0)))
        out = pl.pallas_call(
            _mlp_kernel,
            out_shape=jax.ShapeDtypeStruct((padded, 1), jnp.float32),
            in_specs=[pl.BlockSpec(memory_space=pltpu.MemorySpace.VMEM)] * 2,
            out_specs=pl.BlockSpec(memory_space=pltpu.MemorySpace.VMEM),
            cost_estimate=cost,
        )(xp, packed)
        return out[:batch]

    # Large batch: 1-D batch-parallel grid (v7x shards rows across both TCs);
    # the weight slab keeps a constant block index so it is DMA'd once per core.
    padded = pl.cdiv(batch, batch_block) * batch_block
    xp = x if padded == batch else jnp.pad(x, ((0, padded - batch), (0, 0)))
    out = pl.pallas_call(
        _mlp_kernel,
        out_shape=jax.ShapeDtypeStruct((padded, 1), jnp.float32),
        grid=(padded // batch_block,),
        in_specs=[pl.BlockSpec((batch_block, in_dim), lambda i: (i, 0)),
                  pl.BlockSpec((_SLAB_ROWS, LANES), lambda i: (0, 0))],
        out_specs=pl.BlockSpec((batch_block, 1), lambda i: (i, 0)),
        compiler_params=pltpu.CompilerParams(dimension_semantics=("parallel",)),
        cost_estimate=cost,
    )(xp, packed)
    return out[:batch]


def mlp_reference(x, params, bn):
    """Unfused eval-mode reference (dropout = identity, BN = running stats)."""
    (w1, b1), (w2, b2), (w3, b3), (w4, b4), (w5, b5), (w6, b6), (w7, b7), (w8, b8) = params
    gamma, beta, mean, var = bn
    h = x.astype(jnp.float32)
    h = jnp.maximum(h @ w1 + b1, 0.0)
    h = h @ w2 + b2
    h = jnp.maximum(h @ w3 + b3, 0.0)
    h = h @ w4 + b4
    h = (h - mean) / jnp.sqrt(var + BN_EPS) * gamma + beta
    h = jnp.maximum(h @ w5 + b5, 0.0)
    h = h @ w6 + b6
    h = jnp.maximum(h @ w7 + b7, 0.0)
    h = h @ w8 + b8
    return h


if __name__ == "__main__":
    key = jax.random.PRNGKey(0)
    key, kx = jax.random.split(key)

    batch, input_dim = 64, LAYER_DIMS[0]
    x = jax.random.normal(kx, (batch, input_dim), jnp.float32)

    params, bn = init_params(key)
    packed = pack_params(params, bn)

    # Small batch: gridless path.
    out = jax.block_until_ready(mlp_forward(x, packed))
    ref = mlp_reference(x, params, bn)
    assert out.shape == (batch, 1), out.shape
    max_err = float(jnp.max(jnp.abs(out - ref)))
    assert jnp.allclose(out, ref, atol=1e-3, rtol=1e-3), max_err

    # Ragged small batch (exercises sublane padding on the gridless path).
    key, krx = jax.random.split(key)
    xr = jax.random.normal(krx, (50, input_dim), jnp.float32)
    out_r = jax.block_until_ready(mlp_forward(xr, packed))
    ref_r = mlp_reference(xr, params, bn)
    assert out_r.shape == (50, 1), out_r.shape
    assert jnp.allclose(out_r, ref_r, atol=1e-3, rtol=1e-3), (
        float(jnp.max(jnp.abs(out_r - ref_r))))

    # Larger batch: exercise the batch-parallel grid path.
    key, kbx = jax.random.split(key)
    xb = jax.random.normal(kbx, (2048, input_dim), jnp.float32)
    out_big = jax.block_until_ready(mlp_forward(xb, packed))
    ref_big = mlp_reference(xb, params, bn)
    assert out_big.shape == (2048, 1), out_big.shape
    assert jnp.allclose(out_big, ref_big, atol=1e-3, rtol=1e-3), (
        float(jnp.max(jnp.abs(out_big - ref_big))))

    print("KERNEL_OK")
</pallas_src>

<mosaic_0001>
module attributes {stable_mosaic.version = 11 : i64} {
  func.func @_mlp_kernel(%arg0: memref<64x8xf32, #tpu.memory_space<vmem>>, %arg1: memref<352x256xf32, #tpu.memory_space<vmem>>, %arg2: memref<64x1xf32, #tpu.memory_space<vmem>>) attributes {dimension_semantics = [], scalar_prefetch = 0 : i64, scratch_operands = 0 : i64, tpu.core_type = #tpu.core_type<tc>} {
    %c0 = arith.constant 0 : index
    %c0_0 = arith.constant 0 : index
    %0 = vector.load %arg0[%c0, %c0_0] : memref<64x8xf32, #tpu.memory_space<vmem>>, vector<64x8xf32>
    %c0_1 = arith.constant 0 : index
    %c0_2 = arith.constant 0 : index
    %1 = vector.load %arg1[%c0_1, %c0_2] : memref<352x256xf32, #tpu.memory_space<vmem>>, vector<8x256xf32>
    %c8 = arith.constant 8 : index
    %c0_3 = arith.constant 0 : index
    %2 = vector.load %arg1[%c8, %c0_3] : memref<352x256xf32, #tpu.memory_space<vmem>>, vector<256x64xf32>
    %c264 = arith.constant 264 : index
    %c0_4 = arith.constant 0 : index
    %3 = vector.load %arg1[%c264, %c0_4] : memref<352x256xf32, #tpu.memory_space<vmem>>, vector<64x16xf32>
    %c328 = arith.constant 328 : index
    %c0_5 = arith.constant 0 : index
    %4 = vector.load %arg1[%c328, %c0_5] : memref<352x256xf32, #tpu.memory_space<vmem>>, vector<16x4xf32>
    %c344 = arith.constant 344 : index
    %c0_6 = arith.constant 0 : index
    %5 = vector.load %arg1[%c344, %c0_6] : memref<352x256xf32, #tpu.memory_space<vmem>>, vector<8x256xf32>
    %6 = vector.extract_strided_slice %5 {offsets = [0, 0], sizes = [1, 256], strides = [1, 1]} : vector<8x256xf32> to vector<1x256xf32>
    %7 = vector.extract_strided_slice %5 {offsets = [1, 0], sizes = [1, 64], strides = [1, 1]} : vector<8x256xf32> to vector<1x64xf32>
    %8 = vector.extract_strided_slice %5 {offsets = [2, 0], sizes = [1, 16], strides = [1, 1]} : vector<8x256xf32> to vector<1x16xf32>
    %9 = vector.extract_strided_slice %5 {offsets = [3, 0], sizes = [1, 4], strides = [1, 1]} : vector<8x256xf32> to vector<1x4xf32>
    %10 = vector.extract_strided_slice %5 {offsets = [4, 0], sizes = [1, 4], strides = [1, 1]} : vector<8x256xf32> to vector<1x4xf32>
    %11 = vector.extract_strided_slice %5 {offsets = [5, 0], sizes = [1, 1], strides = [1, 1]} : vector<8x256xf32> to vector<1x1xf32>
    %cst = arith.constant dense<0.000000e+00> : vector<64x256xf32>
    %12 = tpu.matmul %0, %1, %cst {dimension_numbers = #tpu.dot_dimension_numbers<[1], [0], [0], [1], [0, 0, 1, 1], [], []>} : vector<64x8xf32>, vector<8x256xf32>, vector<64x256xf32> -> vector<64x256xf32>
    %13 = vector.broadcast %6 : vector<1x256xf32> to vector<64x256xf32>
    %14 = arith.addf %12, %13 : vector<64x256xf32>
    %cst_7 = arith.constant 0.000000e+00 : f32
    %15 = vector.broadcast %cst_7 : f32 to vector<64x256xf32>
    %16 = arith.maximumf %14, %15 : vector<64x256xf32>
    %cst_8 = arith.constant dense<0.000000e+00> : vector<64x64xf32>
    %17 = tpu.matmul %16, %2, %cst_8 {dimension_numbers = #tpu.dot_dimension_numbers<[1], [0], [0], [1], [0, 0, 1, 1], [], []>} : vector<64x256xf32>, vector<256x64xf32>, vector<64x64xf32> -> vector<64x64xf32>
    %18 = vector.broadcast %7 : vector<1x64xf32> to vector<64x64xf32>
    %19 = arith.addf %17, %18 : vector<64x64xf32>
    %cst_9 = arith.constant 0.000000e+00 : f32
    %20 = vector.broadcast %cst_9 : f32 to vector<64x64xf32>
    %21 = arith.maximumf %19, %20 : vector<64x64xf32>
    %cst_10 = arith.constant dense<0.000000e+00> : vector<64x16xf32>
    %22 = tpu.matmul %21, %3, %cst_10 {dimension_numbers = #tpu.dot_dimension_numbers<[1], [0], [0], [1], [0, 0, 1, 1], [], []>} : vector<64x64xf32>, vector<64x16xf32>, vector<64x16xf32> -> vector<64x16xf32>
    %23 = vector.broadcast %8 : vector<1x16xf32> to vector<64x16xf32>
    %24 = arith.addf %22, %23 : vector<64x16xf32>
    %cst_11 = arith.constant 0.000000e+00 : f32
    %25 = vector.broadcast %cst_11 : f32 to vector<64x16xf32>
    %26 = arith.maximumf %24, %25 : vector<64x16xf32>
    %cst_12 = arith.constant dense<0.000000e+00> : vector<64x4xf32>
    %27 = tpu.matmul %26, %4, %cst_12 {dimension_numbers = #tpu.dot_dimension_numbers<[1], [0], [0], [1], [0, 0, 1, 1], [], []>} : vector<64x16xf32>, vector<16x4xf32>, vector<64x4xf32> -> vector<64x4xf32>
    %28 = vector.broadcast %9 : vector<1x4xf32> to vector<64x4xf32>
    %29 = arith.addf %27, %28 : vector<64x4xf32>
    %cst_13 = arith.constant 0.000000e+00 : f32
    %30 = vector.broadcast %cst_13 : f32 to vector<64x4xf32>
    %31 = arith.maximumf %29, %30 : vector<64x4xf32>
    %32 = vector.broadcast %10 : vector<1x4xf32> to vector<64x4xf32>
    %33 = arith.mulf %31, %32 : vector<64x4xf32>
    %cst_14 = arith.constant dense<0.000000e+00> : vector<64xf32>
    %34 = vector.multi_reduction <add>, %33, %cst_14 [1] : vector<64x4xf32> to vector<64xf32>
    %35 = vector.shape_cast %34 : vector<64xf32> to vector<64x1xf32>
    %36 = vector.broadcast %11 : vector<1x1xf32> to vector<64x1xf32>
    %37 = arith.addf %35, %36 : vector<64x1xf32>
    %c0_15 = arith.constant 0 : index
    %c0_16 = arith.constant 0 : index
    %38 = vector.load %arg2[%c0_15, %c0_16] : memref<64x1xf32, #tpu.memory_space<vmem>>, vector<64x1xf32>
    tpu.vector_store %arg2[%c0_15, %c0_16], %37 {strides = array<i32>} : memref<64x1xf32, #tpu.memory_space<vmem>>, vector<64x1xf32>,
    return
  }
}

</mosaic_0001>

<bundles_post_ra>
// kernel: tpu_custom_call.1
= control target key start
LH: loop header
LB: loop body
LE: loop exit
PB: predicated region body
PF: predicated region fallthrough
CT: control target
= control target key end

     0   :  { %7 = vsyncpa [#allocation3], 0  ;;  %s935_s9 = smov [#allocation2]   ;;  %s1078_s0 = inlined_call_operand.vmem [shape: f32[64,8], index: 0, kind: input, shape index: {}]   ;;  %s1079_s1 = inlined_call_operand.hbm [shape: f32[352,256], index: 1, kind: input, shape index: {}]   ;;  %s1080_s2 = inlined_call_operand.vmem [shape: f32[64,1], index: 2, kind: output, shape index: {}]  }
   0x1   :  { %s15_s10 = sshll.u32 %s935_s9, 4  ;;  %s911_s13 = scalar_lea.hbm %s1079_s1, 11264  ;;  %s16_s10 = int_to_ptr.vmem [resolvable:$true] %s15_s10 }
   0x2   :  { %p912_p0 = scmp.ne.s32.totalorder %s1079_s1, %s911_s13  ;;  %p915_p1 = scmp.lt.u32.totalorder %s911_s13, %s1079_s1 }
   0x4   :  { %p917_p2 = pnand %p915_p1, %p912_p0 }
   0x6   :  { %920 = shalt.err (!%p917_p2)
}
   0x7   :  { %s921_s18 = scalar_lea.vmem %s16_s10, 11264  ;;  %p926_p4 = scmp.lt.s32.totalorder %s16_s10, %s16_s10 }
   0x8   :  { %p922_p3 = scmp.ne.s32.totalorder %s16_s10, %s921_s18  ;;  %p927_p5 = scmp.lt.s32.totalorder %s921_s18, %s921_s18 }
   0xa   :  { %p928_p6 = por %p927_p5, %p926_p4 }
   0xc   :  { %p929_p7 = pnand %p928_p6, %p922_p3 }
   0xe   :  { %932 = shalt.err (!%p929_p7)
}
   0xf   :  { %s936_s19 = smov 256   ;;  %s937_s20 = smov 16  }
  0x10   :  { %21 = dma.hbm_to_vmem [thread:$0]  %s1079_s1, 11264, %s16_s10, [#allocation3], %s936_s19, %s936_s19, %s937_s20  }
  0x11   :  { %933 = dma.done.wait [#allocation3], 11264  }
  0x12   :  { %934 = vsyncadd [#allocation3], 4294956032  ;;  %v938_v0 = vmov 0.0   ;;  %v34_v1 = vld [vmem:[#allocation2 + $0x8] sm:$0xff]  ;;  %v33_v2 = vld [vmem:[#allocation2] sm:$0xff]  ;;  %vm87_vm0 = vcmask 64512  }
  0x13   :  { %176 = vmatprep.mubr.f32.mxu0 %v938_v0  ;;  %v25_v3 = vld [vmem:[%s1078_s0] sm:$0xff]  ;;  %112 = vmatprep.subr.mxu0 %v34_v1  ;;  %v26_v4 = vld [vmem:[%s1078_s0 + $0x8] sm:$0xff]  ;;  %v51_v5 = vld [vmem:[#allocation2 + $0x110] sm:$0xff]  ;;  %v79_v1 = vlaneseq  ;;  %vm362_vm1 = vcmask 523264   ;;  %vm504_vm2 = vcmask 130048   ;;  %vm654_vm3 = vcmask 31744  }
  0x14   :  { %113 = vmatpush1.msra.mxu0 %v33_v2  ;;  %v52_v6 = vld [vmem:[#allocation2 + $0x120] sm:$0xff]  ;;  %v35_v8 = vld [vmem:[#allocation2 + $0x10] sm:$0xff]  ;;  %v28_v26 = vld [vmem:[%s1078_s0 + $0x18] sm:$0xff]  ;;  %vm691_vm4 = vcmask 7168  }
  0x15   :  { %705 = vmatmul.mubr.msk.f32.vlgmr.msra.gmra.mrb[0].mxu0 %vm87_vm0, %v25_v3  ;;  %v855_v7 = vpack.c.bf16 %v52_v6, %v51_v5  ;;  %v36_v9 = vld [vmem:[#allocation2 + $0x20] sm:$0xff]  ;;  %v53_v10 = vld [vmem:[#allocation2 + $0x130] sm:$0xff]  ;;  %v30_v40 = vld [vmem:[%s1078_s0 + $0x28] sm:$0xff]  ;;  %v1006_v2 = vshrl.u32 %v79_v1, 7 }
  0x16   :  { %182 = vmatprep.mubr.f32.mxu0 %v938_v0  ;;  %v857_v11 = vpack.c.bf16 %v36_v9, %v35_v8  ;;  %v54_v12 = vld [vmem:[#allocation2 + $0x140] sm:$0xff]  ;;  %v37_v13 = vld [vmem:[#allocation2 + $0x30] sm:$0xff]  ;;  %v32_v49 = vld [vmem:[%s1078_s0 + $0x38] sm:$0xff] }
  0x17   :  { %v38_v14 = vld [vmem:[#allocation2 + $0x40] sm:$0xff]  ;;  %856 = vmatprep.subr.bf16.mxu1 %v855_v7  ;;  %v859_v15 = vpack.c.bf16 %v54_v12, %v53_v10  ;;  %v55_v16 = vld [vmem:[#allocation2 + $0x150] sm:$0xff]  ;;  %v81_v3 = vsub.s32 0, %v1006_v2  ;;  %v78_v5 = vld [vmem:[#allocation2 + $0x2b8] sm:$0xff]  ;;  %v243_v1 = vsub.s32 1, %v1006_v2 }
  0x18   :  { %v56_v17 = vld [vmem:[#allocation2 + $0x160] sm:$0xff]  ;;  %858 = vmatpush3.bf16.msra.mxu1 %v857_v11  ;;  %v861_v18 = vpack.c.bf16 %v38_v14, %v37_v13  ;;  %v27_v19 = vld [vmem:[%s1078_s0 + $0x10] sm:$0xff] }
  0x19   :  { %706 = vmatmul.mubr.msk.f32.gmra.mrb[2].mxu0 %vm87_vm0, %v26_v4  ;;  %860 = vmatprep.subr.bf16.mxu1 %v859_v15  ;;  %v863_v20 = vpack.c.bf16 %v56_v17, %v55_v16  ;;  %v39_v21 = vld [vmem:[#allocation2 + $0x50] sm:$0xff]  ;;  %v40_v22 = vld [vmem:[#allocation2 + $0x60] sm:$0xff]  ;;  %v86_v7 = vrot.slane %v78_v5, %v81_v3 }
  0x1a   :  { %188 = vmatprep.mubr.f32.mxu0 %v938_v0  ;;  %v57_v23 = vld [vmem:[#allocation2 + $0x170] sm:$0xff]  ;;  %v58_v24 = vld [vmem:[#allocation2 + $0x180] sm:$0xff]  ;;  %v865_v25 = vpack.c.bf16 %v40_v22, %v39_v21 }
  0x1b   :  { %v867_v27 = vpack.c.bf16 %v58_v24, %v57_v23  ;;  %v41_v28 = vld [vmem:[#allocation2 + $0x70] sm:$0xff]  ;;  %v42_v29 = vld [vmem:[#allocation2 + $0x80] sm:$0xff] }
  0x1c   :  { %862 = vmatpush3.bf16.msra.mxu1 %v861_v18  ;;  %v59_v30 = vld [vmem:[#allocation2 + $0x190] sm:$0xff]  ;;  %v60_v31 = vld [vmem:[#allocation2 + $0x1a0] sm:$0xff]  ;;  %v869_v32 = vpack.c.bf16 %v42_v29, %v41_v28 }
  0x1d   :  { %707 = vmatmul.mubr.msk.f32.gmra.mrb[4].mxu0 %vm87_vm0, %v27_v19  ;;  %864 = vmatprep.subr.bf16.mxu1 %v863_v20  ;;  %v29_v33 = vld [vmem:[%s1078_s0 + $0x20] sm:$0xff]  ;;  %v871_v34 = vpack.c.bf16 %v60_v31, %v59_v30  ;;  %v43_v35 = vld [vmem:[#allocation2 + $0x90] sm:$0xff] }
  0x1e   :  { %194 = vmatprep.mubr.f32.mxu0 %v938_v0  ;;  %v44_v36 = vld [vmem:[#allocation2 + $0xa0] sm:$0xff]  ;;  %v61_v37 = vld [vmem:[#allocation2 + $0x1b0] sm:$0xff] }
  0x1f   :  { %v62_v38 = vld [vmem:[#allocation2 + $0x1c0] sm:$0xff]  ;;  %v873_v39 = vpack.c.bf16 %v44_v36, %v43_v35  ;;  %v45_v42 = vld [vmem:[#allocation2 + $0xb0] sm:$0xff] }
  0x20   :  { %866 = vmatpush3.bf16.msra.mxu1 %v865_v25  ;;  %v875_v41 = vpack.c.bf16 %v62_v38, %v61_v37  ;;  %v46_v43 = vld [vmem:[#allocation2 + $0xc0] sm:$0xff]  ;;  %v63_v44 = vld [vmem:[#allocation2 + $0x1d0] sm:$0xff] }
  0x21   :  { %708 = vmatmul.mubr.msk.f32.gmra.mrb[6].mxu0 %vm87_vm0, %v28_v26  ;;  %868 = vmatprep.subr.bf16.mxu1 %v867_v27  ;;  %v64_v45 = vld [vmem:[#allocation2 + $0x1e0] sm:$0xff]  ;;  %v877_v46 = vpack.c.bf16 %v46_v43, %v45_v42  ;;  %v31_v47 = vld [vmem:[%s1078_s0 + $0x30] sm:$0xff] }
  0x22   :  { %200 = vmatprep.mubr.f32.mxu0 %v938_v0  ;;  %v879_v48 = vpack.c.bf16 %v64_v45, %v63_v44  ;;  %v47_v50 = vld [vmem:[#allocation2 + $0xd0] sm:$0xff]  ;;  %v48_v51 = vld [vmem:[#allocation2 + $0xe0] sm:$0xff] }
  0x23   :  { %v881_v52 = vpack.c.bf16 %v48_v51, %v47_v50  ;;  %v65_v53 = vld [vmem:[#allocation2 + $0x1f0] sm:$0xff]  ;;  %v66_v54 = vld [vmem:[#allocation2 + $0x200] sm:$0xff] }
  0x24   :  { %870 = vmatpush3.bf16.msra.mxu1 %v869_v32  ;;  %v883_v55 = vpack.c.bf16 %v66_v54, %v65_v53  ;;  %v49_v56 = vld [vmem:[#allocation2 + $0xf0] sm:$0xff]  ;;  %v50_v57 = vld [vmem:[#allocation2 + $0x100] sm:$0xff] }
  0x25   :  { %709 = vmatmul.mubr.msk.f32.gmra.mrb[8].mxu0 %vm87_vm0, %v29_v33  ;;  %872 = vmatprep.subr.bf16.mxu1 %v871_v34  ;;  %v885_v58 = vpack.c.bf16 %v50_v57, %v49_v56  ;;  %v67_v59 = vld [vmem:[#allocation2 + $0x210] sm:$0xff]  ;;  %v68_v60 = vld [vmem:[#allocation2 + $0x220] sm:$0xff] }
  0x26   :  { %206 = vmatprep.mubr.f32.mxu0 %v938_v0  ;;  %v69_v61 = vld [vmem:[#allocation2 + $0x230] sm:$0xff]  ;;  %v887_v62 = vpack.c.bf16 %v68_v60, %v67_v59  ;;  %v70_v63 = vld [vmem:[#allocation2 + $0x240] sm:$0xff] }
  0x27   :  { %v1009_v4 = vld [vmem:[#allocation2 + $0x2b0] sm:$0xff]  ;;  %v72_v57 = vld [vmem:[#allocation2 + $0x260] sm:$0xff] }
  0x28   :  { %874 = vmatpush3.bf16.msra.mxu1 %v873_v39  ;;  %888 = vmatprep.subr.bf16.mxu0 %v887_v62  ;;  %v82_v6 = vrot.slane %v1009_v4, %v81_v3  ;;  %v71_v56 = vld [vmem:[#allocation2 + $0x250] sm:$0xff]  ;;  %v74_v60 = vld [vmem:[#allocation2 + $0x280] sm:$0xff]  ;;  %v244_v5 = vrot.slane %v1009_v4, %v243_v1 }
  0x29   :  { %710 = vmatmul.mubr.msk.f32.gmra.mrb[10].mxu0 %vm87_vm0, %v30_v40  ;;  %876 = vmatprep.subr.bf16.mxu1 %v875_v41  ;;  %v73_v59 = vld [vmem:[#allocation2 + $0x270] sm:$0xff] }
  0x2a   :  { %212 = vmatprep.mubr.f32.mxu0 %v938_v0  ;;  %890 = vmatpush3.bf16.msra.mxu0 %v887_v62  ;;  %v75_v62 = vld [vmem:[#allocation2 + $0x290] sm:$0xff] }
  0x2c   :  { %878 = vmatpush3.bf16.msra.mxu1 %v877_v46 }
  0x2d   :  { %711 = vmatmul.mubr.msk.f32.gmra.mrb[12].mxu0 %vm87_vm0, %v31_v47  ;;  %880 = vmatprep.subr.bf16.mxu1 %v879_v48 }
  0x2e   :  { %218 = vmatprep.mubr.f32.mxu0 %v938_v0  ;;  %v891_v0 = vpack.c.bf16 %v70_v63, %v69_v61  ;;  %v899_v61 = vpack.c.bf16 %v74_v60, %v73_v59  ;;  %v76_v63 = vld [vmem:[#allocation2 + $0x2a0] sm:$0xff] }
  0x30   :  { %882 = vmatpush3.bf16.msra.mxu1 %v881_v52  ;;  %892 = vmatprep.subr.bf16.mxu0 %v891_v0 }
  0x31   :  { %712 = vmatmul.mubr.msk.f32.gmra.mrb[14].mxu0 %vm87_vm0, %v32_v49  ;;  %884 = vmatprep.subr.bf16.mxu1 %v883_v55 }
  0x32   :  { %894 = vmatpush3.bf16.msra.mxu0 %v891_v0  ;;  %v903_v0 = vpack.c.bf16 %v76_v63, %v75_v62 }
  0x34   :  { %886 = vmatpush3.bf16.msra.mxu1 %v885_v58  ;;  %v895_v58 = vpack.c.bf16 %v72_v57, %v71_v56 }
  0x36   :  { %896 = vmatprep.subr.bf16.mxu0 %v895_v58 }
  0x37   :  { %898 = vmatpush3.bf16.msra.mxu0 %v895_v58 }
  0x38   :  { %900 = vmatprep.subr.bf16.mxu0 %v899_v61 }
  0x3b   :  { %902 = vmatpush3.bf16.msra.mxu0 %v899_v61 }
  0x3c   :  { %904 = vmatprep.subr.bf16.mxu0 %v903_v0 }
  0xe8   :  { %v178_v8 = vpop.f32.mrb[0].mxu0 }
  0xe9   :  { %v179_v9 = vadd.f32 %v178_v8, %v82_v6  ;;  %v180_v10 = vpop.f32.mrb[1].mxu0 }
  0xea   :  { %v181_v11 = vadd.f32 %v180_v10, %v86_v7 }
  0xeb   :  { %v225_v14 = vmax.f32 %v179_v9, 0.0 }
  0xec   :  { %v184_v12 = vpop.f32.mrb[2].mxu0  ;;  %v226_v13 = vmax.f32 %v181_v11, 0.0 }
  0xed   :  { %v185_v15 = vadd.f32 %v184_v12, %v82_v6  ;;  %v186_v16 = vpop.f32.mrb[3].mxu0 }
  0xee   :  { %v187_v17 = vadd.f32 %v186_v16, %v86_v7  ;;  %309 = vmatprep.mubr.f32.mxu1 %v226_v13 }
  0xef   :  { %310 = vmatmul.mubr.f32.vlgmr.msra.gmra.mrb[0].mxu1 %v225_v14  ;;  %v227_v20 = vmax.f32 %v185_v15, 0.0 }
  0xf0   :  { %v228_v18 = vmax.f32 %v187_v17, 0.0  ;;  %v190_v19 = vpop.f32.mrb[4].mxu0 }
  0xf1   :  { %v191_v21 = vadd.f32 %v190_v19, %v82_v6  ;;  %v192_v22 = vpop.f32.mrb[5].mxu0 }
  0xf2   :  { %v193_v23 = vadd.f32 %v192_v22, %v86_v7  ;;  %314 = vmatprep.mubr.f32.mxu1 %v228_v18 }
  0xf3   :  { %315 = vmatmul.mubr.f32.gmra.mrb[2].mxu1 %v227_v20  ;;  %v229_v26 = vmax.f32 %v191_v21, 0.0 }
  0xf4   :  { %v230_v24 = vmax.f32 %v193_v23, 0.0  ;;  %v196_v25 = vpop.f32.mrb[6].mxu0 }
  0xf5   :  { %v197_v27 = vadd.f32 %v196_v25, %v82_v6  ;;  %v198_v28 = vpop.f32.mrb[7].mxu0 }
  0xf6   :  { %v199_v29 = vadd.f32 %v198_v28, %v86_v7  ;;  %319 = vmatprep.mubr.f32.mxu1 %v230_v24 }
  0xf7   :  { %320 = vmatmul.mubr.f32.gmra.mrb[4].mxu1 %v229_v26  ;;  %v231_v32 = vmax.f32 %v197_v27, 0.0 }
  0xf8   :  { %v232_v30 = vmax.f32 %v199_v29, 0.0  ;;  %v202_v31 = vpop.f32.mrb[8].mxu0 }
  0xf9   :  { %v203_v33 = vadd.f32 %v202_v31, %v82_v6  ;;  %v204_v34 = vpop.f32.mrb[9].mxu0 }
  0xfa   :  { %v205_v35 = vadd.f32 %v204_v34, %v86_v7  ;;  %324 = vmatprep.mubr.f32.mxu1 %v232_v30 }
  0xfb   :  { %325 = vmatmul.mubr.f32.gmra.mrb[6].mxu1 %v231_v32  ;;  %v233_v38 = vmax.f32 %v203_v33, 0.0 }
  0xfc   :  { %v234_v36 = vmax.f32 %v205_v35, 0.0  ;;  %v208_v37 = vpop.f32.mrb[10].mxu0 }
  0xfd   :  { %v209_v39 = vadd.f32 %v208_v37, %v82_v6  ;;  %v210_v40 = vpop.f32.mrb[11].mxu0 }
  0xfe   :  { %v211_v41 = vadd.f32 %v210_v40, %v86_v7  ;;  %329 = vmatprep.mubr.f32.mxu1 %v234_v36 }
  0xff   :  { %330 = vmatmul.mubr.f32.gmra.mrb[8].mxu1 %v233_v38  ;;  %v235_v44 = vmax.f32 %v209_v39, 0.0 }
 0x100   :  { %v236_v42 = vmax.f32 %v211_v41, 0.0  ;;  %v214_v43 = vpop.f32.mrb[12].mxu0 }
 0x101   :  { %v215_v45 = vadd.f32 %v214_v43, %v82_v6  ;;  %v216_v46 = vpop.f32.mrb[13].mxu0 }
 0x102   :  { %v217_v47 = vadd.f32 %v216_v46, %v86_v7  ;;  %334 = vmatprep.mubr.f32.mxu1 %v236_v42 }
 0x103   :  { %335 = vmatmul.mubr.f32.gmra.mrb[10].mxu1 %v235_v44  ;;  %v237_v50 = vmax.f32 %v215_v45, 0.0  ;;  %v360_v45 = vsub.s32 2, %v1006_v2 }
 0x104   :  { %v238_v48 = vmax.f32 %v217_v47, 0.0  ;;  %v220_v49 = vpop.f32.mrb[14].mxu0 }
 0x105   :  { %v221_v51 = vadd.f32 %v220_v49, %v82_v6  ;;  %v222_v52 = vpop.f32.mrb[15].mxu0  ;;  %v361_v46 = vrot.slane %v1009_v4, %v360_v45 }
 0x106   :  { %v223_v53 = vadd.f32 %v222_v52, %v86_v7  ;;  %339 = vmatprep.mubr.f32.mxu1 %v238_v48 }
 0x107   :  { %340 = vmatmul.mubr.f32.gmra.mrb[12].mxu1 %v237_v50  ;;  %v239_v55 = vmax.f32 %v221_v51, 0.0 }
 0x108   :  { %v240_v54 = vmax.f32 %v223_v53, 0.0 }
 0x10a   :  { %344 = vmatprep.mubr.f32.mxu1 %v240_v54 }
 0x10b   :  { %345 = vmatmul.mubr.f32.gmra.mrb[14].mxu1 %v239_v55 }
 0x1c2   :  { %v761_v3 = vpop.f32.mrb[0].mxu1 }
 0x1c3   :  { %v762_v6 = vpop.f32.mrb[1].mxu1 }
 0x1c4   :  { %v763_v7 = vadd.f32 %v762_v6, %v761_v3 }
 0x1c6   :  { %v312_v8 = vadd.f32 %v763_v7, %v244_v5  ;;  %v764_v9 = vpop.f32.mrb[2].mxu1 }
 0x1c7   :  { %v765_v10 = vpop.f32.mrb[3].mxu1 }
 0x1c8   :  { %v350_v11 = vmax.f32 %v312_v8, 0.0  ;;  %v766_v12 = vadd.f32 %v765_v10, %v764_v9  ;;  %v502_v9 = vsub.s32 3, %v1006_v2 }
 0x1ca   :  { %v317_v13 = vadd.f32 %v766_v12, %v244_v5  ;;  %v767_v14 = vpop.f32.mrb[4].mxu1  ;;  %827 = vmatprep.mubr.msk.f32.mxu0 %vm362_vm1, %v350_v11  ;;  %v503_v10 = vrot.slane %v1009_v4, %v502_v9  ;;  %v644_v11 = vsub.s32 4, %v1006_v2 }
 0x1cb   :  { %v768_v15 = vpop.f32.mrb[5].mxu1 }
 0x1cc   :  { %v351_v16 = vmax.f32 %v317_v13, 0.0  ;;  %v769_v17 = vadd.f32 %v768_v15, %v767_v14  ;;  %v645_v15 = vrot.slane %v1009_v4, %v644_v11 }
 0x1ce   :  { %v322_v18 = vadd.f32 %v769_v17, %v244_v5  ;;  %v770_v19 = vpop.f32.mrb[6].mxu1  ;;  %828 = vmatmul.mubr.msk.f32.vlgmr.msra.gmra.mrb[16].mxu0 %vm362_vm1, %v351_v16 }
 0x1cf   :  { %v771_v20 = vpop.f32.mrb[7].mxu1  ;;  %906 = vmatpush3.bf16.msra.mxu0 %v903_v0 }
 0x1d0   :  { %v352_v21 = vmax.f32 %v322_v18, 0.0  ;;  %v772_v22 = vadd.f32 %v771_v20, %v770_v19 }
 0x1d2   :  { %v327_v23 = vadd.f32 %v772_v22, %v244_v5  ;;  %v773_v24 = vpop.f32.mrb[8].mxu1  ;;  %830 = vmatprep.mubr.msk.f32.mxu0 %vm362_vm1, %v352_v21 }
 0x1d3   :  { %v774_v25 = vpop.f32.mrb[9].mxu1 }
 0x1d4   :  { %v353_v26 = vmax.f32 %v327_v23, 0.0  ;;  %v775_v27 = vadd.f32 %v774_v25, %v773_v24 }
 0x1d6   :  { %v332_v28 = vadd.f32 %v775_v27, %v244_v5  ;;  %v776_v29 = vpop.f32.mrb[10].mxu1  ;;  %831 = vmatmul.mubr.msk.f32.gmra.mrb[18].mxu0 %vm362_vm1, %v353_v26 }
 0x1d7   :  { %v777_v30 = vpop.f32.mrb[11].mxu1 }
 0x1d8   :  { %v354_v31 = vmax.f32 %v332_v28, 0.0  ;;  %v778_v32 = vadd.f32 %v777_v30, %v776_v29 }
 0x1da   :  { %v337_v33 = vadd.f32 %v778_v32, %v244_v5  ;;  %v779_v34 = vpop.f32.mrb[12].mxu1  ;;  %833 = vmatprep.mubr.msk.f32.mxu0 %vm362_vm1, %v354_v31 }
 0x1db   :  { %v780_v35 = vpop.f32.mrb[13].mxu1 }
 0x1dc   :  { %v355_v36 = vmax.f32 %v337_v33, 0.0  ;;  %v781_v37 = vadd.f32 %v780_v35, %v779_v34 }
 0x1de   :  { %v342_v38 = vadd.f32 %v781_v37, %v244_v5  ;;  %v782_v39 = vpop.f32.mrb[14].mxu1  ;;  %834 = vmatmul.mubr.msk.f32.gmra.mrb[20].mxu0 %vm362_vm1, %v355_v36 }
 0x1df   :  { %v783_v40 = vpop.f32.mrb[15].mxu1 }
 0x1e0   :  { %v356_v41 = vmax.f32 %v342_v38, 0.0  ;;  %v784_v42 = vadd.f32 %v783_v40, %v782_v39 }
 0x1e2   :  { %v347_v43 = vadd.f32 %v784_v42, %v244_v5  ;;  %836 = vmatprep.mubr.msk.f32.mxu0 %vm362_vm1, %v356_v41 }
 0x1e4   :  { %v357_v44 = vmax.f32 %v347_v43, 0.0 }
 0x1e6   :  { %837 = vmatmul.mubr.msk.f32.gmra.mrb[22].mxu0 %vm362_vm1, %v357_v44 }
 0x2a1   :  { %v829_v47 = vpop.f32.mrb[16].mxu0 }
 0x2a2   :  { %v459_v48 = vadd.f32 %v829_v47, %v361_v46  ;;  %v453_v49 = vpop.f32.mrb[17].mxu0 }
 0x2a3   :  { %v454_v50 = vadd.f32 %v453_v49, %v361_v46 }
 0x2a4   :  { %v493_v52 = vmax.f32 %v459_v48, 0.0 }
 0x2a5   :  { %v492_v51 = vmax.f32 %v454_v50, 0.0 }
 0x2a7   :  { %843 = vmatprep.mubr.msk.f32.mxu0 %vm504_vm2, %v492_v51 }
 0x2a8   :  { %844 = vmatmul.mubr.msk.f32.vlgmr.msra.gmra.mrb[24].mxu0 %vm504_vm2, %v493_v52 }
 0x2a9   :  { %v832_v53 = vpop.f32.mrb[18].mxu0 }
 0x2aa   :  { %v469_v54 = vadd.f32 %v832_v53, %v361_v46  ;;  %v463_v55 = vpop.f32.mrb[19].mxu0  ;;  %v681_v53 = vsub.s32 5, %v1006_v2 }
 0x2ab   :  { %v464_v56 = vadd.f32 %v463_v55, %v361_v46 }
 0x2ac   :  { %v495_v58 = vmax.f32 %v469_v54, 0.0  ;;  %v682_v54 = vrot.slane %v1009_v4, %v681_v53 }
 0x2ad   :  { %v494_v57 = vmax.f32 %v464_v56, 0.0 }
 0x2af   :  { %846 = vmatprep.mubr.msk.f32.mxu0 %vm504_vm2, %v494_v57 }
 0x2b0   :  { %847 = vmatmul.mubr.msk.f32.gmra.mrb[26].mxu0 %vm504_vm2, %v495_v58 }
 0x2b1   :  { %v835_v59 = vpop.f32.mrb[20].mxu0 }
 0x2b2   :  { %v479_v60 = vadd.f32 %v835_v59, %v361_v46  ;;  %v473_v61 = vpop.f32.mrb[21].mxu0 }
 0x2b3   :  { %v474_v62 = vadd.f32 %v473_v61, %v361_v46 }
 0x2b4   :  { %v497_v0 = vmax.f32 %v479_v60, 0.0 }
 0x2b5   :  { %v496_v63 = vmax.f32 %v474_v62, 0.0 }
 0x2b7   :  { %849 = vmatprep.mubr.msk.f32.mxu0 %vm504_vm2, %v496_v63 }
 0x2b8   :  { %850 = vmatmul.mubr.msk.f32.gmra.mrb[28].mxu0 %vm504_vm2, %v497_v0 }
 0x2b9   :  { %v838_v1 = vpop.f32.mrb[22].mxu0 }
 0x2ba   :  { %v489_v3 = vadd.f32 %v838_v1, %v361_v46  ;;  %v483_v5 = vpop.f32.mrb[23].mxu0 }
 0x2bb   :  { %v484_v6 = vadd.f32 %v483_v5, %v361_v46 }
 0x2bc   :  { %v499_v8 = vmax.f32 %v489_v3, 0.0 }
 0x2bd   :  { %v498_v7 = vmax.f32 %v484_v6, 0.0 }
 0x2bf   :  { %852 = vmatprep.mubr.msk.f32.mxu0 %vm504_vm2, %v498_v7 }
 0x2c0   :  { %853 = vmatmul.mubr.msk.f32.gmra.mrb[30].mxu0 %vm504_vm2, %v499_v8 }
 0x37b   :  { %v845_v12 = vpop.f32.mrb[24].mxu0 }
 0x37c   :  { %v601_v13 = vadd.f32 %v845_v12, %v503_v10  ;;  %v595_v14 = vpop.f32.mrb[25].mxu0 }
 0x37d   :  { %v596_v16 = vadd.f32 %v595_v14, %v503_v10 }
 0x37e   :  { %v635_v17 = vmax.f32 %v601_v13, 0.0 }
 0x37f   :  { %v634_v18 = vmax.f32 %v596_v16, 0.0 }
 0x380   :  { %v647_v19 = vmul.f32 %v645_v15, %v635_v17 }
 0x381   :  { %v646_v21 = vmul.f32 %v645_v15, %v634_v18 }
 0x382   :  { %v658_v20 = vsel %vm654_vm3, %v647_v19, 0.0 }
 0x383   :  { %659 = vadd.xlane.f32.xlu0 %v658_v20  ;;  %v848_v22 = vpop.f32.mrb[26].mxu0  ;;  %v655_v27 = vsel %vm654_vm3, %v646_v21, 0.0 }
 0x384   :  { %v611_v23 = vadd.f32 %v848_v22, %v503_v10  ;;  %v605_v24 = vpop.f32.mrb[27].mxu0 }
 0x385   :  { %v606_v25 = vadd.f32 %v605_v24, %v503_v10 }
 0x386   :  { %v637_v26 = vmax.f32 %v611_v23, 0.0 }
 0x387   :  { %v636_v28 = vmax.f32 %v606_v25, 0.0  ;;  %656 = vadd.xlane.f32.xlu0 %v655_v27 }
 0x388   :  { %v649_v29 = vmul.f32 %v645_v15, %v637_v26 }
 0x389   :  { %v648_v31 = vmul.f32 %v645_v15, %v636_v28 }
 0x38a   :  { %v664_v30 = vsel %vm654_vm3, %v649_v29, 0.0 }
 0x38b   :  { %665 = vadd.xlane.f32.xlu1 %v664_v30  ;;  %v851_v32 = vpop.f32.mrb[28].mxu0  ;;  %v661_v37 = vsel %vm654_vm3, %v648_v31, 0.0 }
 0x38c   :  { %v621_v33 = vadd.f32 %v851_v32, %v503_v10  ;;  %v615_v34 = vpop.f32.mrb[29].mxu0 }
 0x38d   :  { %v616_v35 = vadd.f32 %v615_v34, %v503_v10 }
 0x38e   :  { %v639_v36 = vmax.f32 %v621_v33, 0.0 }
 0x38f   :  { %v638_v38 = vmax.f32 %v616_v35, 0.0  ;;  %662 = vadd.xlane.f32.xlu1 %v661_v37 }
 0x390   :  { %v651_v39 = vmul.f32 %v645_v15, %v639_v36 }
 0x391   :  { %v650_v40 = vmul.f32 %v645_v15, %v638_v38 }
 0x392   :  { %v670_v41 = vsel %vm654_vm3, %v651_v39, 0.0 }
 0x393   :  { %v854_v42 = vpop.f32.mrb[30].mxu0  ;;  %671 = vadd.xlane.f32.xlu1 %v670_v41  ;;  %v667_v43 = vsel %vm654_vm3, %v650_v40, 0.0 }
 0x394   :  { %v631_v44 = vadd.f32 %v854_v42, %v503_v10  ;;  %v625_v45 = vpop.f32.mrb[31].mxu0  ;;  %668 = vadd.xlane.f32.xlu0 %v667_v43 }
 0x395   :  { %v626_v46 = vadd.f32 %v625_v45, %v503_v10 }
 0x396   :  { %v641_v47 = vmax.f32 %v631_v44, 0.0 }
 0x397   :  { %v640_v48 = vmax.f32 %v626_v46, 0.0 }
 0x398   :  { %v653_v49 = vmul.f32 %v645_v15, %v641_v47 }
 0x399   :  { %v652_v50 = vmul.f32 %v645_v15, %v640_v48 }
 0x39a   :  { %v676_v51 = vsel %vm654_vm3, %v653_v49, 0.0 }
 0x39b   :  { %677 = vadd.xlane.f32.xlu1 %v676_v51  ;;  %v673_v52 = vsel %vm654_vm3, %v652_v50, 0.0 }
 0x39c   :  { %674 = vadd.xlane.f32.xlu0 %v673_v52 }
 0x410   :  { %v660_v55 = vpop.xlane.xlu0 %659 }
 0x411   :  { %v684_v56 = vadd.f32 %v682_v54, %v660_v55 }
 0x413   :  { %693 = vst.msk [vmem:[%s1080_s2 + $0x8] sm:$0xff] %vm691_vm4, %v684_v56 }
 0x414   :  { %v657_v57 = vpop.xlane.xlu0 %656 }
 0x415   :  { %v683_v58 = vadd.f32 %v682_v54, %v657_v57 }
 0x417   :  { %692 = vst.msk [vmem:[%s1080_s2] sm:$0xff] %vm691_vm4, %v683_v58 }
 0x418   :  { %v666_v59 = vpop.xlane.xlu1 %665 }
 0x419   :  { %v686_v60 = vadd.f32 %v682_v54, %v666_v59 }
 0x41b   :  { %695 = vst.msk [vmem:[%s1080_s2 + $0x18] sm:$0xff] %vm691_vm4, %v686_v60 }
 0x41c   :  { %v663_v2 = vpop.xlane.xlu1 %662 }
 0x41d   :  { %v685_v4 = vadd.f32 %v682_v54, %v663_v2 }
 0x41f   :  { %694 = vst.msk [vmem:[%s1080_s2 + $0x10] sm:$0xff] %vm691_vm4, %v685_v4 }
 0x420   :  { %v672_v61 = vpop.xlane.xlu1 %671 }
 0x421   :  { %v688_v62 = vadd.f32 %v682_v54, %v672_v61  ;;  %v669_v63 = vpop.xlane.xlu0 %668 }
 0x422   :  { %v687_v0 = vadd.f32 %v682_v54, %v669_v63 }
 0x423   :  { %697 = vst.msk [vmem:[%s1080_s2 + $0x28] sm:$0xff] %vm691_vm4, %v688_v62 }
 0x424   :  { %696 = vst.msk [vmem:[%s1080_s2 + $0x20] sm:$0xff] %vm691_vm4, %v687_v0 }
 0x428   :  { %v678_v1 = vpop.xlane.xlu1 %677 }
 0x429   :  { %v690_v3 = vadd.f32 %v682_v54, %v678_v1  ;;  %v675_v5 = vpop.xlane.xlu0 %674 }
 0x42a   :  { %v689_v6 = vadd.f32 %v682_v54, %v675_v5 }
 0x42b   :  { %699 = vst.msk [vmem:[%s1080_s2 + $0x38] sm:$0xff] %vm691_vm4, %v690_v3 }
 0x42c   :  { %698 = vst.msk [vmem:[%s1080_s2 + $0x30] sm:$0xff] %vm691_vm4, %v689_v6 }
 0x42d   :  { %704 = vsyncpa [#allocation3], 1 }

</bundles_post_ra>
